<compile_context>
chip_gen: v5e
topology: v5e:2x2
jax: 0.10.0
libtpu: 0.0.40
codegen_flags: <defaults>
</compile_context>

<pallas_src>
import functools

import jax
import jax.numpy as jnp
from jax.experimental import pallas as pl
from jax.experimental.pallas import tpu as pltpu

LATENT_DIM = 128
TOUCH_INP = 3
GAZE_INP = 4


def _glimpse_kernel(window_size, touch_dim, gaze_dim, latent,
                    starts_ref,                       # SMEM, (bs,) int32 (scalar prefetch)
                    data_ref,                         # VMEM, (1, num_ts, 8) packed touch|gaze
                    wt1_ref, bt1_ref, wt2_ref, bt2_ref,
                    wg1_ref, bg1_ref, wg2_ref, bg2_ref,
                    out_ref):                         # VMEM, (1, 1, 2*latent)
    b = pl.program_id(0)
    s = starts_ref[b]                                 # scalar window start for this batch

    # Fused gather: slice the W-row window out of the resident sequence block.
    seq_ref = data_ref.at[0]                          # (num_ts, 8) ref view, no load
    win = seq_ref[pl.ds(s, window_size), :]           # (W, 8)

    # ---- layer-1 as VPU broadcast-FMAs (keep the MXU free) -----------------
    # touch: h = b1 + sum_k x[:, k] * W1[k]     (K = 3)
    h_t = bt1_ref[...]                                # (1, latent), broadcasts on first add
    for k in range(touch_dim):
        h_t = h_t + win[:, k:k + 1] * wt1_ref[k:k + 1, :]
    m_t = jnp.mean(jnp.maximum(h_t, 0.0), axis=0, keepdims=True)     # (1, latent)

    # gaze: columns [touch_dim, touch_dim+gaze_dim) of the packed stream (K = 4)
    h_g = bg1_ref[...]
    for k in range(gaze_dim):
        c = touch_dim + k
        h_g = h_g + win[:, c:c + 1] * wg1_ref[k:k + 1, :]
    m_g = jnp.mean(jnp.maximum(h_g, 0.0), axis=0, keepdims=True)     # (1, latent)

    # ---- layer-2: mean folded through the linear layer (exact) -------------
    e_t = jnp.dot(m_t, wt2_ref[...], preferred_element_type=jnp.float32) + bt2_ref[...]
    e_g = jnp.dot(m_g, wg2_ref[...], preferred_element_type=jnp.float32) + bg2_ref[...]

    # Direct lane-aligned stores of the two halves (no concat temporary).
    out_ref[0, :, :latent] = e_t
    out_ref[0, :, latent:] = e_g


def _glimpse_pallas(data, starts, params, window_size):
    """data: (bs, num_ts, 8) packed touch|gaze|pad; starts: (bs,) int32."""
    bs, num_ts, feat = data.shape
    latent = params["wt2"].shape[-1]
    ti = params["wt1"].shape[0]
    gi = params["wg1"].shape[0]

    def resident(shape):
        # Weights/biases: full-extent block, constant index -> stays in VMEM
        # across all grid steps (no per-step re-DMA).
        return pl.BlockSpec(shape, lambda b, starts_ref, _n=len(shape): (0,) * _n)

    grid_spec = pltpu.PrefetchScalarGridSpec(
        num_scalar_prefetch=1,                       # `starts` -> SMEM
        grid=(bs,),
        in_specs=[
            pl.BlockSpec((1, num_ts, feat), lambda b, starts_ref: (b, 0, 0)),
            resident((ti, latent)), resident((1, latent)),          # wt1, bt1
            resident((latent, latent)), resident((1, latent)),      # wt2, bt2
            resident((gi, latent)), resident((1, latent)),          # wg1, bg1
            resident((latent, latent)), resident((1, latent)),      # wg2, bg2
        ],
        out_specs=pl.BlockSpec((1, 1, 2 * latent), lambda b, starts_ref: (b, 0, 0)),
    )

    out = pl.pallas_call(
        functools.partial(_glimpse_kernel, window_size, ti, gi, latent),
        out_shape=jax.ShapeDtypeStruct((bs, 1, 2 * latent), jnp.float32),
        grid_spec=grid_spec,
        compiler_params=pltpu.CompilerParams(
            dimension_semantics=("parallel",)),      # batch axis splits across TCs
    )(starts, data,
      params["wt1"], params["bt1"], params["wt2"], params["bt2"],
      params["wg1"], params["bg1"], params["wg2"], params["bg2"])
    return out.reshape(bs, 2 * latent)


def _compute_starts(num_ts, l, window_size):
    starts = (num_ts * l).astype(jnp.int32)          # matches torch's int() truncation
    # TODO(synk): PyTorch falls back to np.random.randint(0, num_ts - window_size)
    # when the window overruns; we clamp deterministically instead.
    starts = jnp.where(starts + window_size > num_ts, num_ts - window_size, starts)
    return jnp.clip(starts, 0, num_ts - window_size)


def glimpse_forward(touch_data, gaze_data, l, params, window_size):
    """Reproduces GLIMPSE.forward (with deterministic overrun handling)."""
    bs, num_ts, _ = touch_data.shape
    starts = _compute_starts(num_ts, l, window_size)
    # Pack touch(3) + gaze(4) into one 8-wide stream: one input DMA per step.
    pad = jnp.zeros((bs, num_ts, 1), jnp.float32)
    data = jnp.concatenate([touch_data, gaze_data, pad], axis=-1)    # (bs, num_ts, 8)
    out = _glimpse_pallas(data, starts, params, window_size)
    return out, starts


def init_params(key):
    """Deterministic init mimicking torch.nn.Linear default U(-1/sqrt(fan_in), ...)."""
    ks = jax.random.split(key, 8)

    def lin(kw, kb, fan_in, fan_out):
        bound = 1.0 / jnp.sqrt(float(fan_in))
        w = jax.random.uniform(kw, (fan_in, fan_out), jnp.float32, -bound, bound)
        b = jax.random.uniform(kb, (1, fan_out), jnp.float32, -bound, bound)
        return w, b

    wt1, bt1 = lin(ks[0], ks[1], TOUCH_INP, LATENT_DIM)
    wt2, bt2 = lin(ks[2], ks[3], LATENT_DIM, LATENT_DIM)
    wg1, bg1 = lin(ks[4], ks[5], GAZE_INP, LATENT_DIM)
    wg2, bg2 = lin(ks[6], ks[7], LATENT_DIM, LATENT_DIM)
    return dict(wt1=wt1, bt1=bt1, wt2=wt2, bt2=bt2,
                wg1=wg1, bg1=bg1, wg2=wg2, bg2=bg2)


def _reference(touch_data, gaze_data, starts, params, window_size):
    """Pure-JAX reference in the original (un-folded) op order."""
    def slice_win(data, s):
        return jax.lax.dynamic_slice(data, (s, 0), (window_size, data.shape[-1]))

    touch_w = jax.vmap(slice_win)(touch_data, starts)                # (bs, W, 3)
    gaze_w = jax.vmap(slice_win)(gaze_data, starts)                  # (bs, W, 4)

    bs, W, td = touch_w.shape
    gd = gaze_w.shape[-1]
    t = touch_w.reshape(bs * W, td)
    h_t = jnp.maximum(t @ params["wt1"] + params["bt1"], 0.0)
    e_t = (h_t @ params["wt2"] + params["bt2"]).reshape(bs, W, -1).mean(axis=1)
    g = gaze_w.reshape(bs * W, gd)
    h_g = jnp.maximum(g @ params["wg1"] + params["bg1"], 0.0)
    e_g = (h_g @ params["wg2"] + params["bg2"]).reshape(bs, W, -1).mean(axis=1)
    return jnp.concatenate([e_t, e_g], axis=-1)


if __name__ == "__main__":
    window_size = 8
    bs, num_ts = 2, 16

    key = jax.random.PRNGKey(0)
    k_touch, k_gaze, k_l, k_params = jax.random.split(key, 4)

    touch_data = jax.random.normal(k_touch, (bs, num_ts, TOUCH_INP), jnp.float32)
    gaze_data = jax.random.normal(k_gaze, (bs, num_ts, GAZE_INP), jnp.float32)
    l = jax.random.uniform(k_l, (bs,), jnp.float32)        # glimpse locations in [0, 1)
    params = init_params(k_params)

    fwd = jax.jit(glimpse_forward, static_argnames=("window_size",))
    out, starts = fwd(touch_data, gaze_data, l, params, window_size=window_size)
    out = jax.block_until_ready(out)

    assert out.shape == (bs, 2 * LATENT_DIM), out.shape
    ref = _reference(touch_data, gaze_data, starts, params, window_size)
    assert jnp.allclose(out, ref, atol=1e-4, rtol=1e-4), "mismatch vs pure-JAX reference"

    print("KERNEL_OK")
</pallas_src>

<mosaic_0001>
module attributes {stable_mosaic.version = 11 : i64} {
  func.func @_glimpse_kernel(%arg0: i32, %arg1: memref<2xi32, #tpu.memory_space<smem>>, %arg2: memref<1x16x8xf32, #tpu.memory_space<vmem>>, %arg3: memref<3x128xf32, #tpu.memory_space<vmem>>, %arg4: memref<1x128xf32, #tpu.memory_space<vmem>>, %arg5: memref<128x128xf32, #tpu.memory_space<vmem>>, %arg6: memref<1x128xf32, #tpu.memory_space<vmem>>, %arg7: memref<4x128xf32, #tpu.memory_space<vmem>>, %arg8: memref<1x128xf32, #tpu.memory_space<vmem>>, %arg9: memref<128x128xf32, #tpu.memory_space<vmem>>, %arg10: memref<1x128xf32, #tpu.memory_space<vmem>>, %arg11: memref<1x1x256xf32, #tpu.memory_space<vmem>>) attributes {dimension_semantics = [#tpu.dimension_semantics<parallel>], iteration_bounds = array<i64: 2>, scalar_prefetch = 1 : i64, scratch_operands = 0 : i64, tpu.core_type = #tpu.core_type<tc>, window_params = [{transform_indices = @transform_0, window_bounds = array<i64: 1, 16, 8>}, {pipeline_mode = #tpu.pipeline_mode<synchronous>, transform_indices = @transform_1, window_bounds = array<i64: 3, 128>}, {pipeline_mode = #tpu.pipeline_mode<synchronous>, transform_indices = @transform_2, window_bounds = array<i64: 1, 128>}, {pipeline_mode = #tpu.pipeline_mode<synchronous>, transform_indices = @transform_3, window_bounds = array<i64: 128, 128>}, {pipeline_mode = #tpu.pipeline_mode<synchronous>, transform_indices = @transform_4, window_bounds = array<i64: 1, 128>}, {pipeline_mode = #tpu.pipeline_mode<synchronous>, transform_indices = @transform_5, window_bounds = array<i64: 4, 128>}, {pipeline_mode = #tpu.pipeline_mode<synchronous>, transform_indices = @transform_6, window_bounds = array<i64: 1, 128>}, {pipeline_mode = #tpu.pipeline_mode<synchronous>, transform_indices = @transform_7, window_bounds = array<i64: 128, 128>}, {pipeline_mode = #tpu.pipeline_mode<synchronous>, transform_indices = @transform_8, window_bounds = array<i64: 1, 128>}, {transform_indices = @transform_9, window_bounds = array<i64: 1, 1, 256>}]} {
    %0 = arith.index_cast %arg0 : i32 to index
    %1 = memref.load %arg1[%0] : memref<2xi32, #tpu.memory_space<smem>>
    %c0_i32 = arith.constant 0 : i32
    %c0_i32_0 = arith.constant 0 : i32
    %c0_i32_1 = arith.constant 0 : i32
    %2 = tpu.memref_slice %arg2[%c0_i32, %c0_i32_0, %c0_i32_1] : memref<1x16x8xf32, #tpu.memory_space<vmem>> -> memref<1x16x8xf32, #tpu.memory_space<vmem>>
    %3 = tpu.memref_squeeze %2 : memref<1x16x8xf32, #tpu.memory_space<vmem>> -> memref<16x8xf32, #tpu.memory_space<vmem>>
    %4 = arith.index_cast %1 : i32 to index
    %c0 = arith.constant 0 : index
    %5 = vector.load %3[%4, %c0] : memref<16x8xf32, #tpu.memory_space<vmem>>, vector<8x8xf32>
    %c0_2 = arith.constant 0 : index
    %c0_3 = arith.constant 0 : index
    %6 = vector.load %arg4[%c0_2, %c0_3] : memref<1x128xf32, #tpu.memory_space<vmem>>, vector<1x128xf32>
    %7 = vector.extract_strided_slice %5 {offsets = [0, 0], sizes = [8, 1], strides = [1, 1]} : vector<8x8xf32> to vector<8x1xf32>
    %c0_4 = arith.constant 0 : index
    %c0_5 = arith.constant 0 : index
    %8 = vector.load %arg3[%c0_4, %c0_5] : memref<3x128xf32, #tpu.memory_space<vmem>>, vector<1x128xf32>
    %9 = vector.broadcast %7 : vector<8x1xf32> to vector<8x128xf32>
    %10 = vector.broadcast %8 : vector<1x128xf32> to vector<8x128xf32>
    %11 = arith.mulf %9, %10 : vector<8x128xf32>
    %12 = vector.broadcast %6 : vector<1x128xf32> to vector<8x128xf32>
    %13 = arith.addf %12, %11 : vector<8x128xf32>
    %14 = vector.extract_strided_slice %5 {offsets = [0, 1], sizes = [8, 1], strides = [1, 1]} : vector<8x8xf32> to vector<8x1xf32>
    %c1 = arith.constant 1 : index
    %c0_6 = arith.constant 0 : index
    %15 = vector.load %arg3[%c1, %c0_6] : memref<3x128xf32, #tpu.memory_space<vmem>>, vector<1x128xf32>
    %16 = vector.broadcast %14 : vector<8x1xf32> to vector<8x128xf32>
    %17 = vector.broadcast %15 : vector<1x128xf32> to vector<8x128xf32>
    %18 = arith.mulf %16, %17 : vector<8x128xf32>
    %19 = arith.addf %13, %18 : vector<8x128xf32>
    %20 = vector.extract_strided_slice %5 {offsets = [0, 2], sizes = [8, 1], strides = [1, 1]} : vector<8x8xf32> to vector<8x1xf32>
    %c2 = arith.constant 2 : index
    %c0_7 = arith.constant 0 : index
    %21 = vector.load %arg3[%c2, %c0_7] : memref<3x128xf32, #tpu.memory_space<vmem>>, vector<1x128xf32>
    %22 = vector.broadcast %20 : vector<8x1xf32> to vector<8x128xf32>
    %23 = vector.broadcast %21 : vector<1x128xf32> to vector<8x128xf32>
    %24 = arith.mulf %22, %23 : vector<8x128xf32>
    %25 = arith.addf %19, %24 : vector<8x128xf32>
    %cst = arith.constant 0.000000e+00 : f32
    %26 = vector.broadcast %cst : f32 to vector<8x128xf32>
    %27 = arith.maximumf %25, %26 : vector<8x128xf32>
    %cst_8 = arith.constant dense<0.000000e+00> : vector<128xf32>
    %28 = vector.multi_reduction <add>, %27, %cst_8 [0] : vector<8x128xf32> to vector<128xf32>
    %29 = vector.shape_cast %28 : vector<128xf32> to vector<1x128xf32>
    %cst_9 = arith.constant 8.000000e+00 : f32
    %30 = vector.broadcast %cst_9 : f32 to vector<1x128xf32>
    %31 = arith.divf %29, %30 : vector<1x128xf32>
    %c0_10 = arith.constant 0 : index
    %c0_11 = arith.constant 0 : index
    %32 = vector.load %arg8[%c0_10, %c0_11] : memref<1x128xf32, #tpu.memory_space<vmem>>, vector<1x128xf32>
    %33 = vector.extract_strided_slice %5 {offsets = [0, 3], sizes = [8, 1], strides = [1, 1]} : vector<8x8xf32> to vector<8x1xf32>
    %c0_12 = arith.constant 0 : index
    %c0_13 = arith.constant 0 : index
    %34 = vector.load %arg7[%c0_12, %c0_13] : memref<4x128xf32, #tpu.memory_space<vmem>>, vector<1x128xf32>
    %35 = vector.broadcast %33 : vector<8x1xf32> to vector<8x128xf32>
    %36 = vector.broadcast %34 : vector<1x128xf32> to vector<8x128xf32>
    %37 = arith.mulf %35, %36 : vector<8x128xf32>
    %38 = vector.broadcast %32 : vector<1x128xf32> to vector<8x128xf32>
    %39 = arith.addf %38, %37 : vector<8x128xf32>
    %40 = vector.extract_strided_slice %5 {offsets = [0, 4], sizes = [8, 1], strides = [1, 1]} : vector<8x8xf32> to vector<8x1xf32>
    %c1_14 = arith.constant 1 : index
    %c0_15 = arith.constant 0 : index
    %41 = vector.load %arg7[%c1_14, %c0_15] : memref<4x128xf32, #tpu.memory_space<vmem>>, vector<1x128xf32>
    %42 = vector.broadcast %40 : vector<8x1xf32> to vector<8x128xf32>
    %43 = vector.broadcast %41 : vector<1x128xf32> to vector<8x128xf32>
    %44 = arith.mulf %42, %43 : vector<8x128xf32>
    %45 = arith.addf %39, %44 : vector<8x128xf32>
    %46 = vector.extract_strided_slice %5 {offsets = [0, 5], sizes = [8, 1], strides = [1, 1]} : vector<8x8xf32> to vector<8x1xf32>
    %c2_16 = arith.constant 2 : index
    %c0_17 = arith.constant 0 : index
    %47 = vector.load %arg7[%c2_16, %c0_17] : memref<4x128xf32, #tpu.memory_space<vmem>>, vector<1x128xf32>
    %48 = vector.broadcast %46 : vector<8x1xf32> to vector<8x128xf32>
    %49 = vector.broadcast %47 : vector<1x128xf32> to vector<8x128xf32>
    %50 = arith.mulf %48, %49 : vector<8x128xf32>
    %51 = arith.addf %45, %50 : vector<8x128xf32>
    %52 = vector.extract_strided_slice %5 {offsets = [0, 6], sizes = [8, 1], strides = [1, 1]} : vector<8x8xf32> to vector<8x1xf32>
    %c3 = arith.constant 3 : index
    %c0_18 = arith.constant 0 : index
    %53 = vector.load %arg7[%c3, %c0_18] : memref<4x128xf32, #tpu.memory_space<vmem>>, vector<1x128xf32>
    %54 = vector.broadcast %52 : vector<8x1xf32> to vector<8x128xf32>
    %55 = vector.broadcast %53 : vector<1x128xf32> to vector<8x128xf32>
    %56 = arith.mulf %54, %55 : vector<8x128xf32>
    %57 = arith.addf %51, %56 : vector<8x128xf32>
    %cst_19 = arith.constant 0.000000e+00 : f32
    %58 = vector.broadcast %cst_19 : f32 to vector<8x128xf32>
    %59 = arith.maximumf %57, %58 : vector<8x128xf32>
    %cst_20 = arith.constant dense<0.000000e+00> : vector<128xf32>
    %60 = vector.multi_reduction <add>, %59, %cst_20 [0] : vector<8x128xf32> to vector<128xf32>
    %61 = vector.shape_cast %60 : vector<128xf32> to vector<1x128xf32>
    %cst_21 = arith.constant 8.000000e+00 : f32
    %62 = vector.broadcast %cst_21 : f32 to vector<1x128xf32>
    %63 = arith.divf %61, %62 : vector<1x128xf32>
    %c0_22 = arith.constant 0 : index
    %c0_23 = arith.constant 0 : index
    %64 = vector.load %arg5[%c0_22, %c0_23] : memref<128x128xf32, #tpu.memory_space<vmem>>, vector<128x128xf32>
    %cst_24 = arith.constant dense<0.000000e+00> : vector<1x128xf32>
    %65 = tpu.matmul %31, %64, %cst_24 {dimension_numbers = #tpu.dot_dimension_numbers<[1], [0], [0], [1], [0, 0, 1, 1], [], []>} : vector<1x128xf32>, vector<128x128xf32>, vector<1x128xf32> -> vector<1x128xf32>
    %c0_25 = arith.constant 0 : index
    %c0_26 = arith.constant 0 : index
    %66 = vector.load %arg6[%c0_25, %c0_26] : memref<1x128xf32, #tpu.memory_space<vmem>>, vector<1x128xf32>
    %67 = arith.addf %65, %66 : vector<1x128xf32>
    %c0_27 = arith.constant 0 : index
    %c0_28 = arith.constant 0 : index
    %68 = vector.load %arg9[%c0_27, %c0_28] : memref<128x128xf32, #tpu.memory_space<vmem>>, vector<128x128xf32>
    %cst_29 = arith.constant dense<0.000000e+00> : vector<1x128xf32>
    %69 = tpu.matmul %63, %68, %cst_29 {dimension_numbers = #tpu.dot_dimension_numbers<[1], [0], [0], [1], [0, 0, 1, 1], [], []>} : vector<1x128xf32>, vector<128x128xf32>, vector<1x128xf32> -> vector<1x128xf32>
    %c0_30 = arith.constant 0 : index
    %c0_31 = arith.constant 0 : index
    %70 = vector.load %arg10[%c0_30, %c0_31] : memref<1x128xf32, #tpu.memory_space<vmem>>, vector<1x128xf32>
    %71 = arith.addf %69, %70 : vector<1x128xf32>
    %c0_32 = arith.constant 0 : index
    %c0_33 = arith.constant 0 : index
    %c0_34 = arith.constant 0 : index
    %72 = vector.load %arg11[%c0_32, %c0_33, %c0_34] : memref<1x1x256xf32, #tpu.memory_space<vmem>>, vector<1x1x128xf32>
    %73 = vector.shape_cast %72 : vector<1x1x128xf32> to vector<1x128xf32>
    %74 = vector.shape_cast %67 : vector<1x128xf32> to vector<1x1x128xf32>
    tpu.vector_store %arg11[%c0_32, %c0_33, %c0_34], %74 {strides = array<i32>} : memref<1x1x256xf32, #tpu.memory_space<vmem>>, vector<1x1x128xf32>,
    %c0_35 = arith.constant 0 : index
    %c0_36 = arith.constant 0 : index
    %c128 = arith.constant 128 : index
    %75 = vector.load %arg11[%c0_35, %c0_36, %c128] : memref<1x1x256xf32, #tpu.memory_space<vmem>>, vector<1x1x128xf32>
    %76 = vector.shape_cast %75 : vector<1x1x128xf32> to vector<1x128xf32>
    %77 = vector.shape_cast %71 : vector<1x128xf32> to vector<1x1x128xf32>
    tpu.vector_store %arg11[%c0_35, %c0_36, %c128], %77 {strides = array<i32>} : memref<1x1x256xf32, #tpu.memory_space<vmem>>, vector<1x1x128xf32>,
    return
  }
  func.func @transform_0(%arg0: i32, %arg1: memref<2xi32, #tpu.memory_space<smem>>) -> (i32, i32, i32) {
    %c0_i32 = arith.constant 0 : i32
    %c0_i32_0 = arith.constant 0 : i32
    %c0_i32_1 = arith.constant 0 : i32
    return %arg0, %c0_i32, %c0_i32_0 : i32, i32, i32
  }
  func.func @transform_1(%arg0: i32, %arg1: memref<2xi32, #tpu.memory_space<smem>>) -> (i32, i32) {
    %c0_i32 = arith.constant 0 : i32
    %c0_i32_0 = arith.constant 0 : i32
    %c0_i32_1 = arith.constant 0 : i32
    return %c0_i32, %c0_i32_0 : i32, i32
  }
  func.func @transform_2(%arg0: i32, %arg1: memref<2xi32, #tpu.memory_space<smem>>) -> (i32, i32) {
    %c0_i32 = arith.constant 0 : i32
    %c0_i32_0 = arith.constant 0 : i32
    %c0_i32_1 = arith.constant 0 : i32
    return %c0_i32, %c0_i32_0 : i32, i32
  }
  func.func @transform_3(%arg0: i32, %arg1: memref<2xi32, #tpu.memory_space<smem>>) -> (i32, i32) {
    %c0_i32 = arith.constant 0 : i32
    %c0_i32_0 = arith.constant 0 : i32
    %c0_i32_1 = arith.constant 0 : i32
    return %c0_i32, %c0_i32_0 : i32, i32
  }
  func.func @transform_4(%arg0: i32, %arg1: memref<2xi32, #tpu.memory_space<smem>>) -> (i32, i32) {
    %c0_i32 = arith.constant 0 : i32
    %c0_i32_0 = arith.constant 0 : i32
    %c0_i32_1 = arith.constant 0 : i32
    return %c0_i32, %c0_i32_0 : i32, i32
  }
  func.func @transform_5(%arg0: i32, %arg1: memref<2xi32, #tpu.memory_space<smem>>) -> (i32, i32) {
    %c0_i32 = arith.constant 0 : i32
    %c0_i32_0 = arith.constant 0 : i32
    %c0_i32_1 = arith.constant 0 : i32
    return %c0_i32, %c0_i32_0 : i32, i32
  }
  func.func @transform_6(%arg0: i32, %arg1: memref<2xi32, #tpu.memory_space<smem>>) -> (i32, i32) {
    %c0_i32 = arith.constant 0 : i32
    %c0_i32_0 = arith.constant 0 : i32
    %c0_i32_1 = arith.constant 0 : i32
    return %c0_i32, %c0_i32_0 : i32, i32
  }
  func.func @transform_7(%arg0: i32, %arg1: memref<2xi32, #tpu.memory_space<smem>>) -> (i32, i32) {
    %c0_i32 = arith.constant 0 : i32
    %c0_i32_0 = arith.constant 0 : i32
    %c0_i32_1 = arith.constant 0 : i32
    return %c0_i32, %c0_i32_0 : i32, i32
  }
  func.func @transform_8(%arg0: i32, %arg1: memref<2xi32, #tpu.memory_space<smem>>) -> (i32, i32) {
    %c0_i32 = arith.constant 0 : i32
    %c0_i32_0 = arith.constant 0 : i32
    %c0_i32_1 = arith.constant 0 : i32
    return %c0_i32, %c0_i32_0 : i32, i32
  }
  func.func @transform_9(%arg0: i32, %arg1: memref<2xi32, #tpu.memory_space<smem>>) -> (i32, i32, i32) {
    %c0_i32 = arith.constant 0 : i32
    %c0_i32_0 = arith.constant 0 : i32
    %c0_i32_1 = arith.constant 0 : i32
    return %arg0, %c0_i32, %c0_i32_0 : i32, i32, i32
  }
}

</mosaic_0001>

<bundles_post_ra>
// kernel: glimpse_forward.1
= control target key start
LH: loop header
LB: loop body
LE: loop exit
PB: predicated region body
PF: predicated region fallthrough
CT: control target
= control target key end

     0   :  { %s712_s16 = smov [#allocation3]   ;;  %s887_s0 = inlined_call_operand.vmem [shape: s32[2], index: 0, kind: input, shape index: {}]   ;;  %s888_s1 = inlined_call_operand.vmem [shape: f32[2,16,8], index: 1, kind: input, shape index: {}]   ;;  %s889_s2 = inlined_call_operand.vmem [shape: f32[3,128], index: 2, kind: input, shape index: {}]   ;;  %s890_s3 = inlined_call_operand.vmem [shape: f32[1,128], index: 3, kind: input, shape index: {}]   ;;  %s891_s4 = inlined_call_operand.vmem [shape: f32[128,128], index: 4, kind: input, shape index: {}]   ;;  %s892_s5 = inlined_call_operand.vmem [shape: f32[1,128], index: 5, kind: input, shape index: {}]   ;;  %s893_s6 = inlined_call_operand.vmem [shape: f32[4,128], index: 6, kind: input, shape index: {}]   ;;  %s894_s7 = inlined_call_operand.vmem [shape: f32[1,128], index: 7, kind: input, shape index: {}]   ;;  %s895_s8 = inlined_call_operand.hbm [shape: f32[128,128], index: 8, kind: input, shape index: {}]   ;;  %s896_s9 = inlined_call_operand.vmem [shape: f32[1,128], index: 9, kind: input, shape index: {}]   ;;  %s897_s10 = inlined_call_operand.vmem [shape: f32[2,1,256], index: 10, kind: output, shape index: {}]  }
   0x1   :  { %s16_s15 = sshll.u32 %s887_s0, 4  ;;  %s17_s15 = int_to_ptr.vmem [resolvable:$true] %s16_s15 }
   0x2   :  { %19 = dma.vmem_to_smem %s17_s15, 16, %s712_s16, [#allocation2] }
   0x3   :  { %702 = dma.done.wait [#allocation2], 16 }
   0x4   :  { %703 = vsyncadd [#allocation2], 4294967280 }
   0x5   :  { %22 = sfence }
   0x6   :  { %23 = vsyncpa [#allocation5], 0  ;;  %s782_s17 = smov 0  }
   0x7 LB: > { %s283_s0 = sshll.u32 %s895_s8, 4  ;;  %s594_s20 = sadd.s32 4294967295, %s710_s17   ;;  %s710_s17 = sphi %s782_s17, %s29_s17   ;;  %s284_s0 = int_to_ptr.hbm [resolvable:$true] %s283_s0 }
   0x8   : > { %p596_p0 = scmp.ge.s32.totalorder %s710_s17, 1  ;;  %p254_p1 = scmp.lt.s32.totalorder %s710_s17, 3 }
   0x9   : > { %p615_p2 = scmp.eq.s32.totalorder %s594_s20, 0  ;;  %s713_s21 = smov [#allocation4]  }
   0xa   : > { %p255_p3 = pnand %p596_p0, %p254_p1  ;;  %s285_s22 = sshll.u32 %s713_s21, 4  ;;  %s286_s22 = int_to_ptr.vmem [resolvable:$true] %s285_s22 }
   0xb   : > { %s714_s23 = smov 128   ;;  %s715_s24 = smov 8  }
   0xc   : > { %p611_p4 = pneg %p255_p3  ;;  %312 = sbr.rel (%p255_p3) target bundleno = 308 (0x134), region = 56 }
   0xe   : > { %p612_p5 = pnand %p615_p2, %p611_p4 }
  0x10   : > { %614 = dma.hbm_to_vmem [thread:$0]  (!%p612_p5), %s284_s0, 2048, %s286_s22, [#allocation5], %s714_s23, %s714_s23, %s715_s24  }
  0x11   : > { %705 = dma.done.wait (%p615_p2), [#allocation5], 2048  }
  0x12   : > { %707 = vsyncadd (%p615_p2), [#allocation5], 4294965248  ;;  %p348_p6 = scmp.lt.s32.totalorder %s594_s20, 1  ;;  %v716_v0 = vmov 4   ;;  %v717_v1 = vmov 3   ;;  %s357_s25 = sld [smem:[#allocation3 + %s594_s20]] }
  0x13   : > { %639 = vset.pattern.permute.xlu1 %v716_v0  ;;  %637 = vset.pattern.permute.xlu0 %v717_v1  ;;  %v718_v2 = vmov 5   ;;  %v719_v4 = vmov 1   ;;  %v720_v5 = vmov 0   ;;  %v721_v6 = vmov 2   ;;  %v463_v8 = vld [vmem:[%s891_s4 + $0x78] sm:$0xff]  ;;  %v462_v9 = vld [vmem:[%s891_s4 + $0x70] sm:$0xff] }
  0x14   : > { %s899_s20 = smov (!%p348_p6, %s594_s20), 1  ;;  %641 = vset.pattern.permute.xlu2 %v718_v2  ;;  %v722_v7 = vmov 6   ;;  %465 = vmatpush.msra.mxu0 %v463_v8  ;;  %v461_v10 = vld [vmem:[%s891_s4 + $0x68] sm:$0xff]  ;;  %v500_v11 = vld [vmem:[#allocation4 + $0x78] sm:$0xff]  ;;  %v460_v12 = vld [vmem:[%s891_s4 + $0x60] sm:$0xff]  ;;  %v723_v44 = vmov 8.0  }
  0x15   : > { %s606_s26 = sshll.u32 %s899_s20, 4  ;;  %502 = vmatpush.msra.mxu1 %v500_v11  ;;  %v499_v13 = vld [vmem:[#allocation4 + $0x70] sm:$0xff]  ;;  %v459_v14 = vld [vmem:[%s891_s4 + $0x58] sm:$0xff]  ;;  %v498_v15 = vld [vmem:[#allocation4 + $0x68] sm:$0xff]  ;;  %654 = vrcp.f32 %v723_v44  ;;  %s603_s24 = sshll.u32 %s899_s20, 1 }
  0x16   : > { %s352_s29 = scalar_lea.vmem %s888_s1, %s606_s26  ;;  %466 = vmatpush.msra.mxu0 %v462_v9  ;;  %v458_v16 = vld [vmem:[%s891_s4 + $0x50] sm:$0xff]  ;;  %v497_v17 = vld [vmem:[#allocation4 + $0x60] sm:$0xff]  ;;  %v457_v18 = vld [vmem:[%s891_s4 + $0x48] sm:$0xff] }
  0x17   : > { %503 = vmatpush.msra.mxu1 %v499_v13  ;;  %v496_v19 = vld [vmem:[#allocation4 + $0x58] sm:$0xff]  ;;  %v456_v20 = vld [vmem:[%s891_s4 + $0x40] sm:$0xff]  ;;  %v495_v21 = vld [vmem:[#allocation4 + $0x50] sm:$0xff] }
  0x18   : > { %s358_s30 = scalar_lea.vmem %s352_s29, %s357_s25  ;;  %467 = vmatpush.msra.mxu0 %v461_v10  ;;  %v455_v22 = vld [vmem:[%s891_s4 + $0x38] sm:$0xff]  ;;  %v494_v23 = vld [vmem:[#allocation4 + $0x48] sm:$0xff]  ;;  %v454_v24 = vld [vmem:[%s891_s4 + $0x30] sm:$0xff]  ;;  %s356_s29 = scalar_lea.vmem %s897_s10, %s603_s24 }
  0x19   : > { %v359_v3 = vld [vmem:[%s358_s30] sm:$0xff]  ;;  %504 = vmatpush.msra.mxu1 %v498_v15  ;;  %v453_v26 = vld [vmem:[%s891_s4 + $0x28] sm:$0xff]  ;;  %v492_v27 = vld [vmem:[#allocation4 + $0x38] sm:$0xff] }
  0x1a   : > { %418 = vperm.xlu1 %639, %v359_v3   ;;  %407 = vperm.xlu0 %637, %v359_v3   ;;  %v493_v25 = vld [vmem:[#allocation4 + $0x40] sm:$0xff]  ;;  %v491_v29 = vld [vmem:[#allocation4 + $0x30] sm:$0xff]  ;;  %v451_v30 = vld [vmem:[%s891_s4 + $0x18] sm:$0xff] }
  0x1b   : > { %426 = vperm.xlu2 %641, %v359_v3   ;;  %468 = vmatpush.msra.mxu0 %v460_v12  ;;  %v452_v28 = vld [vmem:[%s891_s4 + $0x20] sm:$0xff]  ;;  %v490_v31 = vld [vmem:[#allocation4 + $0x28] sm:$0xff]  ;;  %v450_v32 = vld [vmem:[%s891_s4 + $0x10] sm:$0xff]  ;;  %v655_v55 = vpop.eup %654 }
  0x1c   : > { %505 = vmatpush.msra.mxu1 %v497_v17  ;;  %v489_v33 = vld [vmem:[#allocation4 + $0x20] sm:$0xff]  ;;  %v449_v34 = vld [vmem:[%s891_s4 + $0x8] sm:$0xff]  ;;  %v488_v35 = vld [vmem:[#allocation4 + $0x18] sm:$0xff]  ;;  %v397_v63 = vmul.f32 8.0, %v655_v55  ;;  %vm401_vm0 = vweird.f32 %v655_v55 }
  0x1d   : > { %469 = vmatpush.msra.mxu0 %v459_v14  ;;  %v448_v37 = vld [vmem:[%s891_s4] sm:$0xff]  ;;  %v487_v40 = vld [vmem:[#allocation4 + $0x10] sm:$0xff]  ;;  %v486_v41 = vld [vmem:[#allocation4 + $0x8] sm:$0xff] }
  0x1e   : > { %506 = vmatpush.msra.mxu1 %v496_v19  ;;  %v646_v42 = vld [vmem:[%s893_s6] ss:$0 sm:$0xff]  ;;  %v649_v48 = vld [vmem:[%s889_s2 + $0x1] ss:$0 sm:$0xff]  ;;  %v652_v50 = vld [vmem:[%s889_s2 + $0x2] ss:$0 sm:$0xff] }
  0x1f   : > { %470 = vmatpush.msra.mxu0 %v458_v16  ;;  %v485_v43 = vld [vmem:[#allocation4] sm:$0xff] }
  0x20   : > { %507 = vmatpush.msra.mxu1 %v495_v21  ;;  %v650_v45 = vld [vmem:[%s889_s2] ss:$0 sm:$0xff]  ;;  %v645_v52 = vld [vmem:[%s893_s6 + $0x1] ss:$0 sm:$0xff]  ;;  %v648_v58 = vld [vmem:[%s893_s6 + $0x2] ss:$0 sm:$0xff] }
  0x21   : > { %471 = vmatpush.msra.mxu0 %v457_v18  ;;  %v647_v46 = vld [vmem:[%s894_s7] ss:$0 sm:$0xff] }
  0x22   : > { %640 = vset.pattern.permute.xlu1 %v719_v4  ;;  %638 = vset.pattern.permute.xlu0 %v720_v5  ;;  %v651_v49 = vld [vmem:[%s890_s3] ss:$0 sm:$0xff]  ;;  %v398_v5 = vsub.f32 1.0, %v397_v63 }
  0x23   : > { %375 = vperm.xlu1 %640, %v359_v3   ;;  %364 = vperm.xlu0 %638, %v359_v3  }
  0x24   : > { %642 = vset.pattern.permute.xlu2 %v721_v6  ;;  %472 = vmatpush.msra.mxu0 %v456_v20  ;;  %v399_v12 = vmul.f32 %v655_v55, %v398_v5 }
  0x25   : > { %383 = vperm.xlu2 %642, %v359_v3   ;;  %508 = vmatpush.msra.mxu1 %v494_v23 }
  0x26   : > { %473 = vmatpush.msra.mxu0 %v455_v22  ;;  %v400_v17 = vadd.f32 %v655_v55, %v399_v12 }
  0x27   : > { %509 = vmatpush.msra.mxu1 %v493_v25 }
  0x28   : > { %474 = vmatpush.msra.mxu0 %v454_v24  ;;  %v402_v22 = vsel %vm401_vm0, %v655_v55, %v400_v17 }
  0x29   : > { %510 = vmatpush.msra.mxu1 %v492_v27 }
  0x2a   : > { %475 = vmatpush.msra.mxu0 %v453_v26 }
  0x2b   : > { %643 = vset.pattern.permute.xlu1 %v722_v7  ;;  %644 = vset.pattern.permute.xlu0 %v722_v7 }
  0x2c   : > { %434 = vperm.xlu1 %643, %v359_v3   ;;  %476 = vmatpush.msra.mxu0 %v452_v28  ;;  %v653_v3 = vld [vmem:[%s893_s6 + $0x3] ss:$0 sm:$0xff] }
  0x2d   : > { %511 = vmatpush.msra.mxu1 %v491_v29  ;;  %v522_v29 = vlaneseq }
  0x2e   : > { %477 = vmatpush.msra.mxu0 %v451_v30  ;;  %v464_v30 = vld [vmem:[%s892_s5] sm:$0x1] }
  0x2f   : > { %512 = vmatpush.msra.mxu1 %v490_v31  ;;  %vm524_vm1 = vcmp.lt.s32.totalorder %v522_v29, 128 }
  0x30   : > { %478 = vmatpush.msra.mxu0 %v450_v32 }
  0x31   : > { %513 = vmatpush.msra.mxu1 %v489_v33  ;;  %v501_v33 = vld [vmem:[%s896_s9] sm:$0x1] }
  0x32   : > { %479 = vmatpush.msra.mxu0 %v449_v34 }
  0x33   : > { %514 = vmatpush.msra.mxu1 %v488_v35 }
  0x34   : > { %480 = vmatpush.msra.mxu0 %v448_v37 }
  0x35   : > { %515 = vmatpush.msra.mxu1 %v487_v40 }
  0x37   : > { %516 = vmatpush.msra.mxu1 %v486_v41 }
  0x39   : > { %517 = vmatpush.msra.mxu1 %v485_v43 }
  0x75   : > { %v427_v36 = vpop.permute.xlu2 %426 }
  0x76   : > { %v430_v2 = vmul.f32 %v648_v58, %v427_v36 }
  0x7f   : > { %v384_v51 = vpop.permute.xlu2 %383 }
  0x80   : > { %v387_v61 = vmul.f32 %v652_v50, %v384_v51 }
  0x8c   : > { %v419_v38 = vpop.permute.xlu1 %418  ;;  %v408_v39 = vpop.permute.xlu0 %407 }
  0x8d   : > { %v411_v47 = vmul.f32 %v646_v42, %v408_v39  ;;  %v422_v62 = vmul.f32 %v645_v52, %v419_v38 }
  0x8f   : > { %v415_v57 = vadd.f32 %v647_v46, %v411_v47 }
  0x91   : > { %v423_v1 = vadd.f32 %v422_v62, %v415_v57 }
  0x93   : > { %v431_v8 = vadd.f32 %v430_v2, %v423_v1 }
  0x95   : > { %v376_v53 = vpop.permute.xlu1 %375  ;;  %v365_v54 = vpop.permute.xlu0 %364 }
  0x96   : > { %v368_v56 = vmul.f32 %v650_v45, %v365_v54  ;;  %v379_v59 = vmul.f32 %v649_v48, %v376_v53 }
  0x98   : > { %v372_v60 = vadd.f32 %v651_v49, %v368_v56 }
  0x9a   : > { %v380_v0 = vadd.f32 %v379_v59, %v372_v60 }
  0x9c   : > { %v388_v4 = vadd.f32 %v387_v61, %v380_v0 }
  0x9e   : > { %v389_v6 = vmax.f32 %v388_v4, 0.0  ;;  %v435_v7 = vpop.permute.xlu1 %434 }
  0x9f   : > { %v438_v9 = vmul.f32 %v653_v3, %v435_v7 }
  0xa0   : > { %v390_v10 = vrot.slane %v389_v6, 4 }
  0xa1   : > { %v439_v11 = vadd.f32 %v438_v9, %v431_v8 }
  0xa2   : > { %v391_v13 = vadd.f32 %v390_v10, %v389_v6 }
  0xa3   : > { %v440_v14 = vmax.f32 %v439_v11, 0.0 }
  0xa4   : > { %v392_v15 = vrot.slane %v391_v13, 2 }
  0xa5   : > { %v441_v16 = vrot.slane %v440_v14, 4 }
  0xa6   : > { %v393_v18 = vadd.f32 %v392_v15, %v391_v13 }
  0xa7   : > { %v442_v19 = vadd.f32 %v441_v16, %v440_v14 }
  0xa8   : > { %v394_v20 = vrot.slane %v393_v18, 1 }
  0xa9   : > { %v443_v21 = vrot.slane %v442_v19, 2 }
  0xaa   : > { %v395_v23 = vadd.f32 %v394_v20, %v393_v18 }
  0xab   : > { %v444_v24 = vadd.f32 %v443_v21, %v442_v19 }
  0xac   : > { %v403_v25 = vmul.f32 %v402_v22, %v395_v23 }
  0xad   : > { %v445_v26 = vrot.slane %v444_v24, 1 }
  0xae   : > { %481 = vmatmul.f32.vlgmr.msra.gmra.mxu0 %v403_v25 }
  0xaf   : > { %v446_v27 = vadd.f32 %v445_v26, %v444_v24 }
  0xb1   : > { %v447_v28 = vmul.f32 %v446_v27, %v402_v22 }
  0xb3   : > { %518 = vmatmul.f32.vlgmr.msra.gmra.mxu1 %v447_v28 }
 0x12b   : > { %v482_v31 = vpop.f32.mrf.mxu0 }
 0x12c   : > { %v483_v32 = vadd.f32 %v482_v31, %v464_v30 }
 0x12e   : > { %526 = vst.msk [vmem:[%s356_s29] sm:$0x1] %vm524_vm1, %v483_v32 }
 0x130   : > { %v519_v34 = vpop.f32.mrf.mxu1 }
 0x131   : > { %v520_v35 = vadd.f32 %v519_v34, %v501_v33 }
 0x133   : > { %527 = vst.msk [vmem:[%s356_s29 + $0x1] sm:$0x1] %vm524_vm1, %v520_v35 }
 0x134 PF: > { %s29_s17 = sadd.s32 1, %s710_s17  }
 0x135   : > { %p26_p7 = scmp.ge.s32.totalorder %s29_s17, 4  }
 0x137   :  { %28 = sbr.rel (!%p26_p7) target bundleno = 7 (0x7), region = 92 }
 0x13c   :  { %547 = vsyncpa [#allocation5], 1 }
 0x13d   :  { %549 = vsyncpa [#allocation5 + $0x1], 1 }

</bundles_post_ra>
